<compile_context>
chip_gen: v6e
topology: v6e:2x2x1
jax: 0.10.0
libtpu: 0.0.40
codegen_flags: <defaults>
</compile_context>

<pallas_src>
import functools

import jax
import jax.numpy as jnp
from jax.experimental import pallas as pl
from jax.experimental.pallas import tpu as pltpu


def _ffn_kernel(x_ref, w1_ref, b1_ref, w2_ref, b2_ref, o_ref, *, n_hc, hc):
    # x_ref : (C, tp)          w1_ref: (Hd, C) bf16   b1_ref: (Hd, 1) f32
    # w2_ref: (C, Hd) bf16     b2_ref: (C, 1)  f32    o_ref : (C, tp)
    x = x_ref[...].astype(jnp.bfloat16)                       # (C, tp)
    acc = jnp.zeros(o_ref.shape, jnp.float32)                 # (C, tp) f32 acc
    for c in range(n_hc):                                     # hidden chunks
        w1c = w1_ref[pl.ds(c * hc, hc), :]                    # (hc, C)  bf16
        b1c = b1_ref[pl.ds(c * hc, hc), :]                    # (hc, 1)  f32
        h = jnp.dot(w1c, x, preferred_element_type=jnp.float32) + b1c
        # SiLU with a single EUP op: sigmoid(z) = 0.5*(tanh(0.5*z)+1)
        h = h * (0.5 * (jnp.tanh(0.5 * h) + 1.0))
        acc = acc + jnp.dot(w2_ref[:, pl.ds(c * hc, hc)],
                            h.astype(jnp.bfloat16),
                            preferred_element_type=jnp.float32)
    o_ref[...] = (acc + b2_ref[...]).astype(o_ref.dtype)


def _vmem_budget_bytes():
    # Generation-aware scoped-VMEM budget (~60% of physical per-core VMEM);
    # conservative 64 MiB (v7x) fallback if the query is unavailable.
    try:
        cap = pltpu.get_tpu_info().vmem_capacity_bytes
    except Exception:
        cap = 64 * 1024 * 1024
    return int(0.6 * cap)


@functools.partial(jax.jit, static_argnames=("tp",))
def feed_forward(x, w1, b1, w2, b2, *, tp=1024):
    """x: (T, B, C, H, W).  w1: (Hd, C), b1: (Hd,), w2: (C, Hd), b2: (C,)
    (PyTorch Conv2d k=1 weight layouts, squeezed).  Returns (T, B, C, H, W)."""
    T, B, C, H, W = x.shape
    Hd = w1.shape[0]
    N = T * B
    P = H * W
    act_bytes = jnp.dtype(x.dtype).itemsize

    # Hidden-dim chunk: bounds the live (hc, tp) intermediate.  Prefer a
    # 256-multiple (fills the 256-wide MXU on v6e/v7x; also a 128-multiple
    # for v5e), otherwise keep the full hidden dim.
    hc = Hd
    for cand in (512, 256, 128):
        if Hd > cand and Hd % cand == 0:
            hc = cand
            break
    n_hc = Hd // hc

    # bf16 weights (MXU-native, halves weight HBM/VMEM traffic); f32 biases
    # reshaped to broadcast over the spatial/lane axis.
    w1b = w1.astype(jnp.bfloat16)
    w2b = w2.astype(jnp.bfloat16)
    b1c = b1.reshape(Hd, 1).astype(jnp.float32)
    b2c = b2.reshape(C, 1).astype(jnp.float32)

    budget = _vmem_budget_bytes()

    def vmem_need(t):
        return (2 * 2 * C * t * act_bytes      # x + out tiles, double-buffered
                + 2 * (Hd * C) * 2             # W1 + W2 bf16, single-buffered
                + (Hd + C) * 4                 # biases
                + C * t * (4 + 2)              # f32 accumulator + bf16 x copy
                + hc * t * (4 + 2))            # f32 hidden chunk + bf16 copy

    def round128(v):
        return max(128, ((v + 127) // 128) * 128)

    kernel = functools.partial(_ffn_kernel, n_hc=n_hc, hc=hc)

    # Grid-invariant operands: constant index_map, single-buffered.
    w_specs = [
        pl.BlockSpec((Hd, C), lambda *_: (0, 0), pipeline_mode=pl.Buffered(1)),
        pl.BlockSpec((Hd, 1), lambda *_: (0, 0), pipeline_mode=pl.Buffered(1)),
        pl.BlockSpec((C, Hd), lambda *_: (0, 0), pipeline_mode=pl.Buffered(1)),
        pl.BlockSpec((C, 1), lambda *_: (0, 0), pipeline_mode=pl.Buffered(1)),
    ]

    cost = pl.CostEstimate(
        flops=4 * N * P * C * Hd,              # two matmuls, 2*M*K*N each
        transcendentals=N * P * Hd,            # one tanh per hidden element
        bytes_accessed=2 * N * C * P * act_bytes + 2 * C * Hd * 2 + (Hd + C) * 4,
    )

    if P < 128:
        # Small spatial plane: per-image lane width < 128 would force masked
        # stores, underfill the MXU N-dim, and make the ~0.35us grid-step
        # overhead comparable to the work.  Data is tiny in this regime, so
        # one wrapper transpose to a (C, N*P) matrix is cheap and makes every
        # tile >=128 lanes wide.
        M = N * P
        x2 = jnp.transpose(x.reshape(N, C, P), (1, 0, 2)).reshape(C, M)
        if M <= tp:
            tp_eff, n_sp = M, 1
        else:
            tp_eff = max(128, (tp // 128) * 128)
            n_sp = pl.cdiv(M, tp_eff)
        if n_sp == 1 and M >= 256 and M % 256 == 0:
            tp_eff, n_sp = M // 2, 2           # >=2 grid steps for megacore
        while vmem_need(tp_eff) > budget and tp_eff > 256:
            tp_eff = max(256, round128(tp_eff // 2))
            n_sp = pl.cdiv(M, tp_eff)

        y2 = pl.pallas_call(
            kernel,
            out_shape=jax.ShapeDtypeStruct((C, M), x.dtype),
            grid_spec=pltpu.PrefetchScalarGridSpec(
                num_scalar_prefetch=0,
                grid=(n_sp,),
                in_specs=[pl.BlockSpec((C, tp_eff), lambda j: (0, j))] + w_specs,
                out_specs=pl.BlockSpec((C, tp_eff), lambda j: (0, j)),
            ),
            compiler_params=pltpu.CompilerParams(
                dimension_semantics=("parallel",),
                vmem_limit_bytes=int(min(budget,
                                         max(16 * 1024 * 1024,
                                             2 * vmem_need(tp_eff)))),
            ),
            cost_estimate=cost,
        )(x2, w1b, b1c, w2b, b2c)
        return jnp.transpose(y2.reshape(C, N, P), (1, 0, 2)).reshape(T, B, C, H, W)

    # Large spatial plane: keep NCHW end-to-end (free contiguous reshapes only).
    x3 = x.reshape(N, C, P)
    if P <= tp:
        tp_eff, n_sp = P, 1
    else:
        tp_eff = max(128, (tp // 128) * 128)
        n_sp = pl.cdiv(P, tp_eff)
    if N == 1 and n_sp == 1 and P >= 256:
        tp_eff = round128(pl.cdiv(P, 2))       # >=2 grid steps for megacore
        n_sp = pl.cdiv(P, tp_eff)
    while vmem_need(tp_eff) > budget and tp_eff > 256:
        tp_eff = max(256, round128(tp_eff // 2))
        n_sp = pl.cdiv(P, tp_eff)

    y3 = pl.pallas_call(
        kernel,
        out_shape=jax.ShapeDtypeStruct((N, C, P), x.dtype),
        grid_spec=pltpu.PrefetchScalarGridSpec(
            num_scalar_prefetch=0,
            grid=(N, n_sp),
            in_specs=[pl.BlockSpec((pl.Squeezed(), C, tp_eff),
                                   lambda n, j: (n, 0, j))] + w_specs,
            out_specs=pl.BlockSpec((pl.Squeezed(), C, tp_eff),
                                   lambda n, j: (n, 0, j)),
        ),
        compiler_params=pltpu.CompilerParams(
            dimension_semantics=("parallel", "parallel"),
            vmem_limit_bytes=int(min(budget,
                                     max(16 * 1024 * 1024,
                                         2 * vmem_need(tp_eff)))),
        ),
        cost_estimate=cost,
    )(x3, w1b, b1c, w2b, b2c)
    return y3.reshape(T, B, C, H, W)

    # TODO(synk): for bf16-tolerant models, pass x in bf16 (halves HBM traffic
    # in the mem-bound regime); the kernel already casts and outputs x.dtype.


def init_params(key, dim, expansion=4, dtype=jnp.float32):
    hidden = dim * expansion
    k1, k2, k3, k4 = jax.random.split(key, 4)
    # Conv2d(k=1) weight layouts (out_ch, in_ch), kernel dims squeezed.
    w1 = jax.random.normal(k1, (hidden, dim), dtype) * (1.0 / jnp.sqrt(dim))
    b1 = jax.random.normal(k2, (hidden,), dtype) * 0.02
    w2 = jax.random.normal(k3, (dim, hidden), dtype) * (1.0 / jnp.sqrt(hidden))
    b2 = jax.random.normal(k4, (dim,), dtype) * 0.02
    return w1, b1, w2, b2


def _reference(x, w1, b1, w2, b2):
    # Pure-JAX f32 reference of the PyTorch forward (1x1 conv == channel matmul).
    h = jnp.einsum('oc,tbchw->tbohw', w1, x) + b1.reshape(1, 1, -1, 1, 1)
    h = h * jax.nn.sigmoid(h)
    y = jnp.einsum('do,tbohw->tbdhw', w2, h) + b2.reshape(1, 1, -1, 1, 1)
    return y


if __name__ == "__main__":
    key = jax.random.PRNGKey(0)
    k_x, k_p = jax.random.split(key)

    T, B, dim, H, W = 2, 2, 4, 8, 8
    expansion = 4

    x = jax.random.normal(k_x, (T, B, dim, H, W), jnp.float32)
    w1, b1, w2, b2 = init_params(k_p, dim, expansion)

    y = feed_forward(x, w1, b1, w2, b2)
    y = jax.block_until_ready(y)

    y_ref = _reference(x, w1, b1, w2, b2)
    assert y.shape == (T, B, dim, H, W)
    # Matmul operands run in bf16 on the MXU (f32 accumulation), so compare
    # against the pure-f32 reference with a bf16-appropriate tolerance.
    assert jnp.allclose(y, y_ref, atol=5e-2, rtol=5e-2), float(
        jnp.max(jnp.abs(y - y_ref)))

    print("KERNEL_OK")
</pallas_src>

<mosaic_0001>
module attributes {stable_mosaic.version = 11 : i64} {
  func.func @_ffn_kernel(%arg0: i32, %arg1: memref<4x128xf32, #tpu.memory_space<vmem>>, %arg2: memref<16x4xbf16, #tpu.memory_space<vmem>>, %arg3: memref<16x1xf32, #tpu.memory_space<vmem>>, %arg4: memref<4x16xbf16, #tpu.memory_space<vmem>>, %arg5: memref<4x1xf32, #tpu.memory_space<vmem>>, %arg6: memref<4x128xf32, #tpu.memory_space<vmem>>) attributes {dimension_semantics = [#tpu.dimension_semantics<parallel>], iteration_bounds = array<i64: 2>, scalar_prefetch = 0 : i64, scratch_operands = 0 : i64, tpu.core_type = #tpu.core_type<tc>, window_params = [{transform_indices = @transform_0, window_bounds = array<i64: 4, 128>}, {pipeline_mode = #tpu.pipeline_mode<synchronous>, transform_indices = @transform_1, window_bounds = array<i64: 16, 4>}, {pipeline_mode = #tpu.pipeline_mode<synchronous>, transform_indices = @transform_2, window_bounds = array<i64: 16, 1>}, {pipeline_mode = #tpu.pipeline_mode<synchronous>, transform_indices = @transform_3, window_bounds = array<i64: 4, 16>}, {pipeline_mode = #tpu.pipeline_mode<synchronous>, transform_indices = @transform_4, window_bounds = array<i64: 4, 1>}, {transform_indices = @transform_5, window_bounds = array<i64: 4, 128>}]} {
    %c0 = arith.constant 0 : index
    %c0_0 = arith.constant 0 : index
    %0 = vector.load %arg1[%c0, %c0_0] : memref<4x128xf32, #tpu.memory_space<vmem>>, vector<4x128xf32>
    %1 = arith.truncf %0 : vector<4x128xf32> to vector<4x128xbf16>
    %cst = arith.constant 0.000000e+00 : f32
    %2 = vector.broadcast %cst : f32 to vector<4x128xf32>
    %c0_1 = arith.constant 0 : index
    %c0_2 = arith.constant 0 : index
    %3 = vector.load %arg2[%c0_1, %c0_2] : memref<16x4xbf16, #tpu.memory_space<vmem>>, vector<16x4xbf16>
    %c0_3 = arith.constant 0 : index
    %c0_4 = arith.constant 0 : index
    %4 = vector.load %arg3[%c0_3, %c0_4] : memref<16x1xf32, #tpu.memory_space<vmem>>, vector<16x1xf32>
    %cst_5 = arith.constant dense<0.000000e+00> : vector<16x128xf32>
    %5 = tpu.matmul %3, %1, %cst_5 {dimension_numbers = #tpu.dot_dimension_numbers<[1], [0], [0], [1], [0, 0, 1, 1], [], []>} : vector<16x4xbf16>, vector<4x128xbf16>, vector<16x128xf32> -> vector<16x128xf32>
    %6 = vector.broadcast %4 : vector<16x1xf32> to vector<16x128xf32>
    %7 = arith.addf %5, %6 : vector<16x128xf32>
    %cst_6 = arith.constant 5.000000e-01 : f32
    %8 = vector.broadcast %cst_6 : f32 to vector<16x128xf32>
    %9 = arith.mulf %8, %7 : vector<16x128xf32>
    %10 = math.tanh %9 : vector<16x128xf32>
    %cst_7 = arith.constant 1.000000e+00 : f32
    %11 = vector.broadcast %cst_7 : f32 to vector<16x128xf32>
    %12 = arith.addf %10, %11 : vector<16x128xf32>
    %cst_8 = arith.constant 5.000000e-01 : f32
    %13 = vector.broadcast %cst_8 : f32 to vector<16x128xf32>
    %14 = arith.mulf %13, %12 : vector<16x128xf32>
    %15 = arith.mulf %7, %14 : vector<16x128xf32>
    %c0_9 = arith.constant 0 : index
    %c0_10 = arith.constant 0 : index
    %16 = vector.load %arg4[%c0_9, %c0_10] : memref<4x16xbf16, #tpu.memory_space<vmem>>, vector<4x16xbf16>
    %17 = arith.truncf %15 : vector<16x128xf32> to vector<16x128xbf16>
    %cst_11 = arith.constant dense<0.000000e+00> : vector<4x128xf32>
    %18 = tpu.matmul %16, %17, %cst_11 {dimension_numbers = #tpu.dot_dimension_numbers<[1], [0], [0], [1], [0, 0, 1, 1], [], []>} : vector<4x16xbf16>, vector<16x128xbf16>, vector<4x128xf32> -> vector<4x128xf32>
    %19 = arith.addf %2, %18 : vector<4x128xf32>
    %c0_12 = arith.constant 0 : index
    %c0_13 = arith.constant 0 : index
    %20 = vector.load %arg5[%c0_12, %c0_13] : memref<4x1xf32, #tpu.memory_space<vmem>>, vector<4x1xf32>
    %21 = vector.broadcast %20 : vector<4x1xf32> to vector<4x128xf32>
    %22 = arith.addf %19, %21 : vector<4x128xf32>
    %c0_14 = arith.constant 0 : index
    %c0_15 = arith.constant 0 : index
    %23 = vector.load %arg6[%c0_14, %c0_15] : memref<4x128xf32, #tpu.memory_space<vmem>>, vector<4x128xf32>
    tpu.vector_store %arg6[%c0_14, %c0_15], %22 {strides = array<i32>} : memref<4x128xf32, #tpu.memory_space<vmem>>, vector<4x128xf32>,
    return
  }
  func.func @transform_0(%arg0: i32) -> (i32, i32) {
    %c0_i32 = arith.constant 0 : i32
    %c0_i32_0 = arith.constant 0 : i32
    return %c0_i32, %arg0 : i32, i32
  }
  func.func @transform_1(%arg0: i32) -> (i32, i32) {
    %c0_i32 = arith.constant 0 : i32
    %c0_i32_0 = arith.constant 0 : i32
    %c0_i32_1 = arith.constant 0 : i32
    return %c0_i32, %c0_i32_0 : i32, i32
  }
  func.func @transform_2(%arg0: i32) -> (i32, i32) {
    %c0_i32 = arith.constant 0 : i32
    %c0_i32_0 = arith.constant 0 : i32
    %c0_i32_1 = arith.constant 0 : i32
    return %c0_i32, %c0_i32_0 : i32, i32
  }
  func.func @transform_3(%arg0: i32) -> (i32, i32) {
    %c0_i32 = arith.constant 0 : i32
    %c0_i32_0 = arith.constant 0 : i32
    %c0_i32_1 = arith.constant 0 : i32
    return %c0_i32, %c0_i32_0 : i32, i32
  }
  func.func @transform_4(%arg0: i32) -> (i32, i32) {
    %c0_i32 = arith.constant 0 : i32
    %c0_i32_0 = arith.constant 0 : i32
    %c0_i32_1 = arith.constant 0 : i32
    return %c0_i32, %c0_i32_0 : i32, i32
  }
  func.func @transform_5(%arg0: i32) -> (i32, i32) {
    %c0_i32 = arith.constant 0 : i32
    %c0_i32_0 = arith.constant 0 : i32
    return %c0_i32, %arg0 : i32, i32
  }
}

</mosaic_0001>

<bundles_post_ra>
// kernel: feed_forward.1
= control target key start
LH: loop header
LB: loop body
LE: loop exit
PB: predicated region body
PF: predicated region fallthrough
CT: control target
= control target key end

     0   :  { %s494_s18 = smov 0   ;;  %s533_s0 = inlined_call_operand.vmem [shape: f32[4,256], index: 0, kind: input, shape index: {}]   ;;  %s534_s1 = inlined_call_operand.vmem [shape: bf16[16,4], index: 1, kind: input, shape index: {}]   ;;  %s535_s2 = inlined_call_operand.vmem [shape: f32[16,1], index: 2, kind: input, shape index: {}]   ;;  %s536_s3 = inlined_call_operand.vmem [shape: bf16[4,16], index: 3, kind: input, shape index: {}]   ;;  %s537_s4 = inlined_call_operand.vmem [shape: f32[4,1], index: 4, kind: input, shape index: {}]   ;;  %s538_s5 = inlined_call_operand.vmem [shape: f32[4,256], index: 5, kind: output, shape index: {}]  }
   0x1 LB: > { %s407_s19 = sadd.s32 4294967295, %s459_s18   ;;  %p411_p0 = scmp.ge.s32.totalorder %s459_s18, 1  ;;  %s459_s18 = sphi %s494_s18, %s15_s18  }
   0x2   : > { %p186_p1 = scmp.lt.s32.totalorder %s459_s18, 3 }
   0x4   : > { %p187_p2 = pnand %p411_p0, %p186_p1 }
   0x5   : > { %p212_p3 = scmp.lt.s32.totalorder (!%p187_p2), %s407_s19, 1 }
   0x6   : > { %190 = sbr.rel (%p187_p2) target bundleno = 446 (0x1be), region = 40 }
   0xb   : > { %v461_v0 = vmov 0.0   ;;  %vm462_vm0 = vmmov 0   ;;  %v225_v1 = vld [vmem:[%s535_s2] sm:$0xff]  ;;  %s540_s19 = smov (!%p212_p3, %s407_s19), 1  ;;  %v463_v2 = vmov 0   ;;  %v226_v3 = vld [vmem:[%s535_s2 + $0x8] sm:$0xff] }
   0xc   : > { %423 = vmatprep.subr.bf16.mxu0 %v461_v0  ;;  %425 = vmatprep.mubr.msk.bf16.mxu0 %vm462_vm0, %v461_v0  ;;  %s412_s22 = sshll.u32 %s540_s19, 2  ;;  %vm246_vm1 = vcmask 1041408   ;;  %v448_v7 = vld [vmem:[%s534_s1] sm:$0xff]   ;;  %vm242_vm2 = vcmask 31744   ;;  %vm309_vm3 = vcmask 130048  }
   0xd   : > { %446 = vset.pattern.permute.xlu0 %v463_v2  ;;  %429 = vmatprep.subr.bf16.mxu1 %v461_v0  ;;  %s215_s27 = scalar_lea.vmem %s533_s0, %s412_s22  ;;  %v303_v8 = vld [vmem:[%s537_s4] sm:$0xf]  ;;  %s219_s11 = scalar_lea.vmem %s538_s5, %s412_s22 }
   0xe   : > { %229 = vperm.xlu0 %446, %v225_v1   ;;  %431 = vmatprep.mubr.msk.bf16.mxu1 %vm462_vm0, %v461_v0  ;;  %v221_v4 = vld [vmem:[%s215_s27] sm:$0xf] }
   0xf   : > { %447 = vset.pattern.permute.xlu1 %v463_v2  ;;  %v222_v5 = vpack.c.bf16 %v221_v4, %v221_v4  ;;  %v301_v28 = vld [vmem:[%s536_s3] sm:$0x3] }
  0x10   : > { %306 = vperm.xlu1 %447, %v303_v8  }
  0x11   : > { %v248_v6 = vsel %vm246_vm1, %v222_v5, 0 }
  0x12   : > { %234 = vperm.xlu0 %446, %v226_v3   ;;  %424 = vmatpush3.bf16.msra.mxu0 %v248_v6 }
  0x15   : > { %426 = vmatmul.mubr.msk.bf16.vlgmr.msra.gmra.mxu0 %vm242_vm2, %v448_v7 }
  0x89   : > { %v230_v9 = vpop.permute.xlu0 %229 }
  0x8b   : > { %v307_v29 = vpop.permute.xlu1 %306 }
  0x8d   : > { %v235_v14 = vpop.permute.xlu0 %234 }
  0xd5   : > { %v284_v10 = vpop.f32.mrf.mxu0 }
  0xd6   : > { %v285_v11 = vadd.f32 %v284_v10, %v230_v9 }
  0xd7   : > { %v427_v12 = vpop.f32.mrf.mxu0 }
  0xd8   : > { %v291_v13 = vmul.f32 0.5, %v285_v11 }
  0xd9   : > { %v287_v15 = vpop.f32.mrf.mxu0 }
  0xda   : > { %449 = vtanh.f32 %v291_v13  ;;  %v288_v16 = vadd.f32 %v287_v15, %v235_v14 }
  0xdb   : > { %v428_v17 = vpop.f32.mrf.mxu0 }
  0xdc   : > { %v292_v18 = vmul.f32 0.5, %v288_v16 }
  0xde   : > { %451 = vtanh.f32 %v292_v18 }
  0xe7   : > { %v450_v19 = vpop.eup %449 }
  0xe8   : > { %v295_v20 = vadd.f32 1.0, %v450_v19 }
  0xea   : > { %v297_v22 = vmul.f32 0.5, %v295_v20 }
  0xeb   : > { %v452_v21 = vpop.eup %451 }
  0xec   : > { %v296_v23 = vadd.f32 1.0, %v452_v21  ;;  %v299_v25 = vmul.f32 %v297_v22, %v285_v11 }
  0xee   : > { %v298_v24 = vmul.f32 0.5, %v296_v23 }
  0xf0   : > { %v300_v26 = vmul.f32 %v298_v24, %v288_v16 }
  0xf2   : > { %v302_v27 = vpack.c.bf16 %v300_v26, %v299_v25 }
  0xf4   : > { %430 = vmatpush3.bf16.msra.mxu1 %v302_v27 }
  0xf7   : > { %432 = vmatmul.mubr.msk.bf16.vlgmr.msra.gmra.mxu1 %vm309_vm3, %v301_v28 }
 0x1b7   : > { %v347_v30 = vpop.f32.mrf.mxu1 }
 0x1b8   : > { %v348_v31 = vadd.f32 %v347_v30, %v307_v29 }
 0x1b9   : > { %v433_v32 = vpop.f32.mrf.mxu1 }
 0x1ba   : > { %353 = vst [vmem:[%s219_s11] sm:$0xf] %v348_v31 }
 0x1bb   : > { %v350_v33 = vpop.f32.mrf.mxu1 }
 0x1bd   : > { %v434_v34 = vpop.f32.mrf.mxu1 }
 0x1be PF: > { %s15_s18 = sadd.s32 1, %s459_s18  }
 0x1bf   : > { %p12_p4 = scmp.ge.s32.totalorder %s15_s18, 4  }
 0x1c1   :  { %14 = sbr.rel (!%p12_p4) target bundleno = 1 (0x1), region = 70 }

</bundles_post_ra>
